<compile_context>
chip_gen: v6e
topology: v6e:2x2x1
jax: 0.10.0
libtpu: 0.0.40
codegen_flags: <defaults>
</compile_context>

<pallas_src>
import math

import jax
import jax.numpy as jnp
from jax.experimental import pallas as pl
from jax.experimental.pallas import tpu as pltpu

_TARGET_BLOCK_BYTES = 4 << 20          # ~4 MiB x-tile (see header for per-gen notes)
_VMEM_LIMIT_BYTES = 32 * 1024 * 1024   # <= ~40 MiB per v7x guidance; fine on v5e/v6e
_MIN_SPLIT_BYTES = 512 * 1024          # force >=2 grid steps above this (v7x megacore)
_SUBLANE_PACK = {4: 8, 2: 16, 1: 32}   # sublanes per 32-bit row-group, by itemsize
_LANE = 128


def _ceil_div(a: int, b: int) -> int:
    return -(-a // b)


# ----------------------------- kernels --------------------------------------

def _pe_add_bcast_kernel(x_ref, pe_ref, o_ref):
    # x_ref/o_ref: (tile_s, B, D); pe_ref: (tile_s, 1, D) -> broadcast over batch.
    o_ref[...] = x_ref[...] + pe_ref[...]


def _make_pe_add_folded_kernel(batch: int, d_model: int):
    # x_ref/o_ref: (tile_s, B*D); pe_ref: (tile_s, D).
    # Only used when D % 128 == 0, so every slice below is lane-aligned:
    # full-width, unmasked vector loads/stores (no sublane padding either).
    def kernel(x_ref, pe_ref, o_ref):
        pe = pe_ref[...]
        for b in range(batch):
            sl = slice(b * d_model, (b + 1) * d_model)
            o_ref[:, sl] = x_ref[:, sl] + pe
    return kernel


# ------------------------- one-time table setup ------------------------------

def make_positional_encoding_table(d_model: int, max_len: int = 5000,
                                   dtype=jnp.float32) -> jnp.ndarray:
    """One-time buffer setup (== torch PositionalEncoding.__init__).

    Returns the table shaped (max_len, 1, d_model) in the model compute dtype
    so the forward pass passes it straight to pallas_call with no per-call ops.
    """
    position = jnp.arange(0, max_len, dtype=jnp.float32)[:, None]           # (L, 1)
    div_term = jnp.exp(
        jnp.arange(0, d_model, 2, dtype=jnp.float32) * (-math.log(10000.0) / d_model)
    )                                                                        # (D//2,)
    pe = jnp.zeros((max_len, d_model), dtype=jnp.float32)
    pe = pe.at[:, 0::2].set(jnp.sin(position * div_term))
    pe = pe.at[:, 1::2].set(jnp.cos(position * div_term))
    return pe.astype(dtype).reshape(max_len, 1, d_model)


# ------------------------------ wrapper --------------------------------------

def _choose_tile_s(seq_len: int, row_bytes: int, *, min_steps: int,
                   sublane_multiple: int = 1) -> int:
    total_bytes = seq_len * row_bytes
    n_steps = max(_ceil_div(total_bytes, _TARGET_BLOCK_BYTES), min_steps, 1)
    n_steps = min(n_steps, seq_len)
    tile_s = _ceil_div(seq_len, n_steps)
    # Prefer a tile_s that divides S evenly (no ragged, underutilized last grid
    # step), as long as it stays within ~2x of the target step count.
    if seq_len % tile_s:
        for cand in range(tile_s, max(tile_s // 2, 1) - 1, -1):
            if seq_len % cand == 0:
                tile_s = cand
                break
    if sublane_multiple > 1:  # folded path: pe block's sublane dim is tile_s
        tile_s = max(sublane_multiple, (tile_s // sublane_multiple) * sublane_multiple)
    return tile_s


@jax.jit
def positional_encoding_forward(x: jnp.ndarray, pe_table: jnp.ndarray) -> jnp.ndarray:
    """x: (S, B, D), pe_table: (max_len, 1, D) in x.dtype.  Returns x + pe[:S]."""
    S, B, D = x.shape
    max_len = pe_table.shape[0]
    assert pe_table.shape == (max_len, 1, D)
    assert max_len >= S, "pe table shorter than sequence (padded last-block reads rely on max_len >= S)"
    assert pe_table.dtype == x.dtype, "build the pe table in the model compute dtype"

    itemsize = jnp.dtype(x.dtype).itemsize
    sublane_pack = _SUBLANE_PACK.get(itemsize, 8)
    total_bytes = S * B * D * itemsize
    min_steps = 2 if total_bytes >= _MIN_SPLIT_BYTES else 1   # feed both v7x TCs

    compiler_params = pltpu.CompilerParams(
        dimension_semantics=("parallel",),         # no cross-step dependence
        vmem_limit_bytes=_VMEM_LIMIT_BYTES,
    )

    use_folded = (B < sublane_pack) and (D % _LANE == 0) and (S >= sublane_pack)

    if use_folded:
        # Small batch underfills the sublane pack; fold it into the lane axis.
        # (S, B, D) -> (S, B*D) is a free contiguous reshape.
        row_bytes = B * D * itemsize
        tile_s = _choose_tile_s(S, row_bytes, min_steps=min_steps,
                                sublane_multiple=sublane_pack)
        grid = (_ceil_div(S, tile_s),)
        x2 = x.reshape(S, B * D)
        pe2 = pe_table.reshape(max_len, D)          # unit-dim reshape: free under jit
        out2 = pl.pallas_call(
            _make_pe_add_folded_kernel(B, D),
            out_shape=jax.ShapeDtypeStruct((S, B * D), x.dtype),
            grid_spec=pltpu.PrefetchScalarGridSpec(
                num_scalar_prefetch=0,
                grid=grid,
                in_specs=[
                    pl.BlockSpec((tile_s, B * D), lambda i: (i, 0)),
                    pl.BlockSpec((tile_s, D), lambda i: (i, 0)),
                ],
                out_specs=pl.BlockSpec((tile_s, B * D), lambda i: (i, 0)),
            ),
            compiler_params=compiler_params,
        )(x2, pe2)
        return out2.reshape(S, B, D)

    # General path: blocks are (tile_s, B, D); last two dims are the full (B, D)
    # extents, so the (8,128) layout rule holds for any B, D; lane-dense stores
    # whenever D is a multiple of 128 (D=512 in production).
    padded_row_bytes = (_ceil_div(B, sublane_pack) * sublane_pack
                        * _ceil_div(D, _LANE) * _LANE * itemsize)
    tile_s = _choose_tile_s(S, padded_row_bytes, min_steps=min_steps)
    grid = (_ceil_div(S, tile_s),)
    return pl.pallas_call(
        _pe_add_bcast_kernel,
        out_shape=jax.ShapeDtypeStruct((S, B, D), x.dtype),
        grid_spec=pltpu.PrefetchScalarGridSpec(
            num_scalar_prefetch=0,
            grid=grid,
            in_specs=[
                pl.BlockSpec((tile_s, B, D), lambda i: (i, 0, 0)),
                pl.BlockSpec((tile_s, 1, D), lambda i: (i, 0, 0)),
            ],
            out_specs=pl.BlockSpec((tile_s, B, D), lambda i: (i, 0, 0)),
        ),
        compiler_params=compiler_params,
    )(x, pe_table)


if __name__ == "__main__":
    key = jax.random.PRNGKey(0)
    k1, k2 = jax.random.split(key)

    # Case 1: small shapes consistent with the module (seq=8, batch=2, d_model=32).
    # B < sublane pack but D % 128 != 0 -> general (S, B, D) path.
    S1, B1, D1 = 8, 2, 32
    pe1 = make_positional_encoding_table(D1, max_len=5000, dtype=jnp.float32)
    x1 = jax.random.normal(k1, (S1, B1, D1), dtype=jnp.float32)
    ref1 = x1 + pe1[:S1]                      # dropout=0 -> identity
    y1 = jax.block_until_ready(positional_encoding_forward(x1, pe1))
    assert y1.shape == (S1, B1, D1)
    assert jnp.allclose(y1, ref1, atol=1e-6), "mismatch vs reference (general path)"

    # Case 2: D a multiple of 128 with a small batch -> exercises the folded,
    # fully lane/sublane-dense (S, B*D) path (matches production D=512, small B).
    S2, B2, D2 = 16, 2, 128
    pe2 = make_positional_encoding_table(D2, max_len=64, dtype=jnp.float32)
    x2 = jax.random.normal(k2, (S2, B2, D2), dtype=jnp.float32)
    ref2 = x2 + pe2[:S2]
    y2 = jax.block_until_ready(positional_encoding_forward(x2, pe2))
    assert y2.shape == (S2, B2, D2)
    assert jnp.allclose(y2, ref2, atol=1e-6), "mismatch vs reference (folded path)"

    print("KERNEL_OK")
</pallas_src>

<mosaic_0001>
module attributes {stable_mosaic.version = 11 : i64} {
  func.func @_pe_add_bcast_kernel(%arg0: i32, %arg1: memref<8x2x32xf32, #tpu.memory_space<vmem>>, %arg2: memref<8x1x32xf32, #tpu.memory_space<vmem>>, %arg3: memref<8x2x32xf32, #tpu.memory_space<vmem>>) attributes {dimension_semantics = [#tpu.dimension_semantics<parallel>], iteration_bounds = array<i64: 1>, scalar_prefetch = 0 : i64, scratch_operands = 0 : i64, tpu.core_type = #tpu.core_type<tc>, window_params = [{transform_indices = @transform_0, window_bounds = array<i64: 8, 2, 32>}, {transform_indices = @transform_1, window_bounds = array<i64: 8, 1, 32>}, {transform_indices = @transform_2, window_bounds = array<i64: 8, 2, 32>}]} {
    %c0 = arith.constant 0 : index
    %c0_0 = arith.constant 0 : index
    %c0_1 = arith.constant 0 : index
    %0 = vector.load %arg1[%c0, %c0_0, %c0_1] : memref<8x2x32xf32, #tpu.memory_space<vmem>>, vector<8x2x32xf32>
    %c0_2 = arith.constant 0 : index
    %c0_3 = arith.constant 0 : index
    %c0_4 = arith.constant 0 : index
    %1 = vector.load %arg2[%c0_2, %c0_3, %c0_4] : memref<8x1x32xf32, #tpu.memory_space<vmem>>, vector<8x1x32xf32>
    %2 = vector.broadcast %1 : vector<8x1x32xf32> to vector<8x2x32xf32>
    %3 = arith.addf %0, %2 : vector<8x2x32xf32>
    %c0_5 = arith.constant 0 : index
    %c0_6 = arith.constant 0 : index
    %c0_7 = arith.constant 0 : index
    %4 = vector.load %arg3[%c0_5, %c0_6, %c0_7] : memref<8x2x32xf32, #tpu.memory_space<vmem>>, vector<8x2x32xf32>
    tpu.vector_store %arg3[%c0_5, %c0_6, %c0_7], %3 {strides = array<i32>} : memref<8x2x32xf32, #tpu.memory_space<vmem>>, vector<8x2x32xf32>,
    return
  }
  func.func @transform_0(%arg0: i32) -> (i32, i32, i32) {
    %c0_i32 = arith.constant 0 : i32
    %c0_i32_0 = arith.constant 0 : i32
    %c0_i32_1 = arith.constant 0 : i32
    return %arg0, %c0_i32, %c0_i32_0 : i32, i32, i32
  }
  func.func @transform_1(%arg0: i32) -> (i32, i32, i32) {
    %c0_i32 = arith.constant 0 : i32
    %c0_i32_0 = arith.constant 0 : i32
    %c0_i32_1 = arith.constant 0 : i32
    return %arg0, %c0_i32, %c0_i32_0 : i32, i32, i32
  }
  func.func @transform_2(%arg0: i32) -> (i32, i32, i32) {
    %c0_i32 = arith.constant 0 : i32
    %c0_i32_0 = arith.constant 0 : i32
    %c0_i32_1 = arith.constant 0 : i32
    return %arg0, %c0_i32, %c0_i32_0 : i32, i32, i32
  }
}

</mosaic_0001>

<bundles_post_ra>
// kernel: positional_encoding_forward.1
= control target key start
LH: loop header
LB: loop body
LE: loop exit
PB: predicated region body
PF: predicated region fallthrough
CT: control target
= control target key end

     0   :  { %vm84_vm0 = vcmask 254976   ;;  %s219_s0 = inlined_call_operand.vmem [shape: f32[8,2,32], index: 0, kind: input, shape index: {}]   ;;  %s220_s1 = inlined_call_operand.vmem [shape: f32[5000,1,32], index: 1, kind: input, shape index: {}]   ;;  %s221_s2 = inlined_call_operand.hbm [shape: f32[8,2,32], index: 2, kind: output, shape index: {}]  }
   0x1   :  { %v12_v0 = vld [vmem:[%s219_s0] sm:$0x3]  ;;  %v13_v3 = vld [vmem:[%s219_s0 + $0x2] sm:$0x3]  ;;  %v14_v5 = vld [vmem:[%s219_s0 + $0x4] sm:$0x3] }
   0x2   :  { %v109_v1 = vld [vmem:[%s220_s1] ss:$0 sm:$0xff]  ;;  %v110_v4 = vld [vmem:[%s220_s1 + $0x1] ss:$0 sm:$0xff]  ;;  %v111_v7 = vld [vmem:[%s220_s1 + $0x2] ss:$0 sm:$0xff] }
   0x3   :  { %v76_v2 = vadd.f32 %v109_v1, %v12_v0  ;;  %v77_v6 = vadd.f32 %v110_v4, %v13_v3  ;;  %v15_v8 = vld [vmem:[%s219_s0 + $0x6] sm:$0x3]  ;;  %v112_v9 = vld [vmem:[%s220_s1 + $0x3] ss:$0 sm:$0xff]  ;;  %v78_v10 = vadd.f32 %v111_v7, %v14_v5  ;;  %v16_v12 = vld [vmem:[%s219_s0 + $0x8] sm:$0x3] }
   0x4   :  { %v79_v11 = vadd.f32 %v112_v9, %v15_v8  ;;  %v113_v13 = vld [vmem:[%s220_s1 + $0x4] ss:$0 sm:$0xff]  ;;  %v17_v14 = vld [vmem:[%s219_s0 + $0xa] sm:$0x3]  ;;  %v114_v16 = vld [vmem:[%s220_s1 + $0x5] ss:$0 sm:$0xff] }
   0x5   :  { %85 = vst.msk [vmem:[#allocation2] sm:$0x3] %vm84_vm0, %v76_v2  ;;  %86 = vst.msk [vmem:[#allocation2 + $0x2] sm:$0x3] %vm84_vm0, %v77_v6  ;;  %v80_v15 = vadd.f32 %v113_v13, %v16_v12  ;;  %v18_v17 = vld [vmem:[%s219_s0 + $0xc] sm:$0x3]  ;;  %v81_v19 = vadd.f32 %v114_v16, %v17_v14 }
   0x6   :  { %v115_v18 = vld [vmem:[%s220_s1 + $0x6] ss:$0 sm:$0xff]  ;;  %87 = vst.msk [vmem:[#allocation2 + $0x4] sm:$0x3] %vm84_vm0, %v78_v10  ;;  %88 = vst.msk [vmem:[#allocation2 + $0x6] sm:$0x3] %vm84_vm0, %v79_v11 }
   0x7   :  { %v82_v20 = vadd.f32 %v115_v18, %v18_v17  ;;  %v19_v21 = vld [vmem:[%s219_s0 + $0xe] sm:$0x3]  ;;  %v116_v22 = vld [vmem:[%s220_s1 + $0x7] ss:$0 sm:$0xff] }
   0x8   :  { %7 = vsyncpa [#allocation3], 0  ;;  %89 = vst.msk [vmem:[#allocation2 + $0x8] sm:$0x3] %vm84_vm0, %v80_v15  ;;  %v83_v23 = vadd.f32 %v116_v22, %v19_v21  ;;  %s142_s13 = smov [#allocation2]  }
   0x9   :  { %s98_s14 = sshll.u32 %s142_s13, 4  ;;  %90 = vst.msk [vmem:[#allocation2 + $0xa] sm:$0x3] %vm84_vm0, %v81_v19  ;;  %91 = vst.msk [vmem:[#allocation2 + $0xc] sm:$0x3] %vm84_vm0, %v82_v20  ;;  %s99_s14 = int_to_ptr.vmem [resolvable:$true] %s98_s14 }
   0xa   :  { %92 = vst.msk [vmem:[#allocation2 + $0xe] sm:$0x3] %vm84_vm0, %v83_v23  ;;  %s120_s15 = scalar_lea.vmem %s99_s14, 256  ;;  %p125_p1 = scmp.lt.s32.totalorder %s99_s14, %s99_s14 }
   0xb   :  { %p121_p0 = scmp.ne.s32.totalorder %s99_s14, %s120_s15  ;;  %p126_p2 = scmp.lt.s32.totalorder %s120_s15, %s120_s15 }
   0xd   :  { %p127_p3 = por %p126_p2, %p125_p1 }
   0xf   :  { %p128_p4 = pnand %p127_p3, %p121_p0 }
  0x11   :  { %131 = shalt.err (!%p128_p4)
}
  0x12   :  { %s143_s0 = smov 32   ;;  %s144_s1 = smov 2  }
  0x13   :  { %104 = dma.vmem_to_hbm [thread:$0]  %s99_s14, 256, %s221_s2, [#allocation3], %s143_s0, %s143_s0, %s144_s1  }
  0x14   :  { %140 = dma.done.wait [#allocation3], 256  }
  0x15   :  { %141 = vsyncadd [#allocation3], 4294967040 }
  0x16   :  { %108 = vsyncpa [#allocation3], 1 }

</bundles_post_ra>
